<compile_context>
chip_gen: v7x
topology: tpu7x:2x2x1
jax: 0.10.0
libtpu: 0.0.40
codegen_flags: <defaults>
</compile_context>

<pallas_src>
import functools
import math

import jax
import jax.numpy as jnp
from jax.experimental import pallas as pl
from jax.experimental.pallas import tpu as pltpu

_LANE = 128            # lane width of a vreg (last dim)
_SUBLANE = 8           # f32 sublane count (second-to-last dim)
_BF16_ROW_ALIGN = 16   # bf16 packs 2 rows/sublane -> keep row offsets 16-aligned


def _round_up(n, m):
    return ((n + m - 1) // m) * m


def _fused_mlp_kernel(x_ref, w_ref, b_ref, o_ref, *,
                      offsets, num_layers, last_activation):
    """x_ref: (TB, in_dim) f32; w_ref: (sum K_i, P) bf16 row-concatenated;
    b_ref: (L, 1, P) f32; o_ref: (TB, P) f32.

    The activation slab is carried through the whole network in vregs: three
    back-to-back MXU matmuls (bf16 operands, f32 accumulation), bias add on the
    VALU slot, tanh on the EUP slot.  Loop is unrolled at trace time.
    """
    h = x_ref[...].astype(jnp.float32)                 # (TB, in_dim)
    seg0 = offsets[1] - offsets[0]
    if h.shape[1] != seg0:                             # only if in_dim not 16-aligned
        h = jnp.pad(h, ((0, 0), (0, seg0 - h.shape[1])))

    for i in range(num_layers):
        lo, hi = offsets[i], offsets[i + 1]
        w = w_ref[lo:hi, :]                            # (K_i, P) bf16, static slice
        b = b_ref[i]                                   # (1, P)  f32
        h = jnp.dot(h.astype(jnp.bfloat16), w,
                    preferred_element_type=jnp.float32) + b
        if last_activation or i < num_layers - 1:
            h = jnp.tanh(h)                            # EUP; padded lanes stay 0
    o_ref[...] = h.astype(o_ref.dtype)


def init_mlp_params(key, hidden_sizes):
    """Deterministic init mimicking nn.Linear's uniform(-1/sqrt(in), 1/sqrt(in))."""
    params = []
    for in_dim, out_dim in zip(hidden_sizes[:-1], hidden_sizes[1:]):
        key, kw, kb = jax.random.split(key, 3)
        bound = 1.0 / math.sqrt(in_dim)
        # stored as (in_dim, out_dim) == transpose of PyTorch's (out_dim, in_dim)
        w = jax.random.uniform(kw, (in_dim, out_dim), jnp.float32, -bound, bound)
        b = jax.random.uniform(kb, (1, out_dim), jnp.float32, -bound, bound)
        params.append((w, b))
    return params


def pack_params(params):
    """Pack L (w, b) pairs into one row-concatenated bf16 weight slab and one
    f32 bias slab.

      w_cat : (seg0 + (L-1)*P, P)  rows [off_i, off_i+K_i) hold layer i's W
      b_cat : (L, 1, P)

    K dims stay exact per layer (first segment only 16-row aligned for bf16
    sublane packing); the lane (output) dim is padded to the common
    P = max_i round_up(out_i, 128) so every layer shares one lane-dense slab.
    """
    in0 = params[0][0].shape[0]
    seg0 = _round_up(in0, _BF16_ROW_ALIGN)
    P = max(_round_up(w.shape[1], _LANE) for w, _ in params)

    offsets = [0, seg0]
    for _ in params[1:]:
        offsets.append(offsets[-1] + P)

    w_cat = jnp.zeros((offsets[-1], P), jnp.bfloat16)
    b_cat = jnp.zeros((len(params), 1, P), jnp.float32)
    for i, (w, b) in enumerate(params):
        k, n = w.shape
        w_cat = w_cat.at[offsets[i]:offsets[i] + k, :n].set(w.astype(jnp.bfloat16))
        b_cat = b_cat.at[i, 0, :n].set(b.reshape(-1))
    return w_cat, b_cat, tuple(offsets), P


def _choose_batch_tile(B):
    """>= 8 rows, <= 256 rows, and >= 2 grid steps for large B (v7x megacore)."""
    b8 = _round_up(max(B, 1), _SUBLANE)
    tb = min(256, _round_up((b8 + 1) // 2, _SUBLANE))
    return max(tb, _SUBLANE)


def mlp_forward(x, w_cat, b_cat, offsets, out_dim, last_activation=True):
    B, in_dim = x.shape
    num_layers = b_cat.shape[0]
    P = w_cat.shape[1]

    tb = _choose_batch_tile(B)
    b_pad = _round_up(B, tb)
    # No feature padding; batch padding only when B isn't a tile multiple.
    x_in = x if b_pad == B else jnp.zeros((b_pad, in_dim), x.dtype).at[:B].set(x)

    kernel = functools.partial(
        _fused_mlp_kernel, offsets=offsets,
        num_layers=num_layers, last_activation=last_activation)

    def call(weight_mode):
        wkw = {} if weight_mode is None else dict(pipeline_mode=weight_mode)
        return pl.pallas_call(
            kernel,
            out_shape=jax.ShapeDtypeStruct((b_pad, P), x.dtype),
            grid=(b_pad // tb,),
            in_specs=[
                pl.BlockSpec((tb, in_dim), lambda i: (i, 0)),        # x tile
                pl.BlockSpec(w_cat.shape, lambda i: (0, 0), **wkw),  # all weights
                pl.BlockSpec(b_cat.shape, lambda i: (0, 0, 0), **wkw),  # all biases
            ],
            out_specs=pl.BlockSpec((tb, P), lambda i: (i, 0)),
            compiler_params=pltpu.CompilerParams(
                dimension_semantics=("parallel",)),   # shards batch tiles on v7x
        )(x_in, w_cat, b_cat)

    try:
        # Grid-invariant weights/biases: single-buffer them (halves resident
        # weight VMEM; matters for large hidden dims on v7x's 64 MiB VMEM).
        out_pad = call(pl.Buffered(1))
    except Exception:
        # Fallback for JAX versions that reject buffer_count=1.
        out_pad = call(None)

    # Only this slice is valid; padded rows/lanes must not be reused downstream.
    return out_pad[:B, :out_dim]


def mlp_reference(x, params, last_activation=True):
    n = len(params)
    for i, (w, b) in enumerate(params):
        x = x @ w + b
        if last_activation or (i < n - 1):
            x = jnp.tanh(x)
    return x


if __name__ == "__main__":
    key = jax.random.PRNGKey(0)
    hidden_sizes = [32, 64, 48, 16]   # MLP([32, 64, 48, 16], activation_cls=nn.Tanh)
    batch = 8

    kx, kp = jax.random.split(key)
    x = jax.random.normal(kx, (batch, hidden_sizes[0]), jnp.float32)
    params = init_mlp_params(kp, hidden_sizes)

    w_cat, b_cat, offsets, _ = pack_params(params)

    out = mlp_forward(x, w_cat, b_cat, offsets, hidden_sizes[-1],
                      last_activation=True)
    out = jax.block_until_ready(out)

    ref = mlp_reference(x, params, last_activation=True)
    assert out.shape == (batch, hidden_sizes[-1])
    # bf16 MXU operands with f32 accumulation -> compare at bf16-level tolerance.
    assert jnp.allclose(out, ref, atol=2e-2, rtol=2e-2)

    print("KERNEL_OK")
</pallas_src>

<mosaic_0001>
module attributes {stable_mosaic.version = 11 : i64} {
  func.func @_fused_mlp_kernel(%arg0: i32, %arg1: memref<8x32xf32, #tpu.memory_space<vmem>>, %arg2: memref<288x128xbf16, #tpu.memory_space<vmem>>, %arg3: memref<3x1x128xf32, #tpu.memory_space<vmem>>, %arg4: memref<8x128xf32, #tpu.memory_space<vmem>>) attributes {dimension_semantics = [#tpu.dimension_semantics<parallel>], iteration_bounds = array<i64: 1>, scalar_prefetch = 0 : i64, scratch_operands = 0 : i64, tpu.core_type = #tpu.core_type<tc>, window_params = [{transform_indices = @transform_0, window_bounds = array<i64: 8, 32>}, {pipeline_mode = #tpu.pipeline_mode<synchronous>, transform_indices = @transform_1, window_bounds = array<i64: 288, 128>}, {pipeline_mode = #tpu.pipeline_mode<synchronous>, transform_indices = @transform_2, window_bounds = array<i64: 3, 1, 128>}, {transform_indices = @transform_3, window_bounds = array<i64: 8, 128>}]} {
    %c0 = arith.constant 0 : index
    %c0_0 = arith.constant 0 : index
    %0 = vector.load %arg1[%c0, %c0_0] : memref<8x32xf32, #tpu.memory_space<vmem>>, vector<8x32xf32>
    %c0_1 = arith.constant 0 : index
    %c0_2 = arith.constant 0 : index
    %1 = vector.load %arg2[%c0_1, %c0_2] : memref<288x128xbf16, #tpu.memory_space<vmem>>, vector<32x128xbf16>
    %c0_3 = arith.constant 0 : index
    %c0_4 = arith.constant 0 : index
    %c0_5 = arith.constant 0 : index
    %2 = vector.load %arg3[%c0_3, %c0_4, %c0_5] : memref<3x1x128xf32, #tpu.memory_space<vmem>>, vector<1x1x128xf32>
    %3 = vector.shape_cast %2 : vector<1x1x128xf32> to vector<1x128xf32>
    %4 = arith.truncf %0 : vector<8x32xf32> to vector<8x32xbf16>
    %cst = arith.constant dense<0.000000e+00> : vector<8x128xf32>
    %5 = tpu.matmul %4, %1, %cst {dimension_numbers = #tpu.dot_dimension_numbers<[1], [0], [0], [1], [0, 0, 1, 1], [], []>} : vector<8x32xbf16>, vector<32x128xbf16>, vector<8x128xf32> -> vector<8x128xf32>
    %6 = vector.broadcast %3 : vector<1x128xf32> to vector<8x128xf32>
    %7 = arith.addf %5, %6 : vector<8x128xf32>
    %8 = math.tanh %7 : vector<8x128xf32>
    %c32 = arith.constant 32 : index
    %c0_6 = arith.constant 0 : index
    %9 = vector.load %arg2[%c32, %c0_6] : memref<288x128xbf16, #tpu.memory_space<vmem>>, vector<128x128xbf16>
    %c1 = arith.constant 1 : index
    %c0_7 = arith.constant 0 : index
    %c0_8 = arith.constant 0 : index
    %10 = vector.load %arg3[%c1, %c0_7, %c0_8] : memref<3x1x128xf32, #tpu.memory_space<vmem>>, vector<1x1x128xf32>
    %11 = vector.shape_cast %10 : vector<1x1x128xf32> to vector<1x128xf32>
    %12 = arith.truncf %8 : vector<8x128xf32> to vector<8x128xbf16>
    %cst_9 = arith.constant dense<0.000000e+00> : vector<8x128xf32>
    %13 = tpu.matmul %12, %9, %cst_9 {dimension_numbers = #tpu.dot_dimension_numbers<[1], [0], [0], [1], [0, 0, 1, 1], [], []>} : vector<8x128xbf16>, vector<128x128xbf16>, vector<8x128xf32> -> vector<8x128xf32>
    %14 = vector.broadcast %11 : vector<1x128xf32> to vector<8x128xf32>
    %15 = arith.addf %13, %14 : vector<8x128xf32>
    %16 = math.tanh %15 : vector<8x128xf32>
    %c160 = arith.constant 160 : index
    %c0_10 = arith.constant 0 : index
    %17 = vector.load %arg2[%c160, %c0_10] : memref<288x128xbf16, #tpu.memory_space<vmem>>, vector<128x128xbf16>
    %c2 = arith.constant 2 : index
    %c0_11 = arith.constant 0 : index
    %c0_12 = arith.constant 0 : index
    %18 = vector.load %arg3[%c2, %c0_11, %c0_12] : memref<3x1x128xf32, #tpu.memory_space<vmem>>, vector<1x1x128xf32>
    %19 = vector.shape_cast %18 : vector<1x1x128xf32> to vector<1x128xf32>
    %20 = arith.truncf %16 : vector<8x128xf32> to vector<8x128xbf16>
    %cst_13 = arith.constant dense<0.000000e+00> : vector<8x128xf32>
    %21 = tpu.matmul %20, %17, %cst_13 {dimension_numbers = #tpu.dot_dimension_numbers<[1], [0], [0], [1], [0, 0, 1, 1], [], []>} : vector<8x128xbf16>, vector<128x128xbf16>, vector<8x128xf32> -> vector<8x128xf32>
    %22 = vector.broadcast %19 : vector<1x128xf32> to vector<8x128xf32>
    %23 = arith.addf %21, %22 : vector<8x128xf32>
    %24 = math.tanh %23 : vector<8x128xf32>
    %c0_14 = arith.constant 0 : index
    %c0_15 = arith.constant 0 : index
    %25 = vector.load %arg4[%c0_14, %c0_15] : memref<8x128xf32, #tpu.memory_space<vmem>>, vector<8x128xf32>
    tpu.vector_store %arg4[%c0_14, %c0_15], %24 {strides = array<i32>} : memref<8x128xf32, #tpu.memory_space<vmem>>, vector<8x128xf32>,
    return
  }
  func.func @transform_0(%arg0: i32) -> (i32, i32) {
    %c0_i32 = arith.constant 0 : i32
    %c0_i32_0 = arith.constant 0 : i32
    return %arg0, %c0_i32 : i32, i32
  }
  func.func @transform_1(%arg0: i32) -> (i32, i32) {
    %c0_i32 = arith.constant 0 : i32
    %c0_i32_0 = arith.constant 0 : i32
    %c0_i32_1 = arith.constant 0 : i32
    return %c0_i32, %c0_i32_0 : i32, i32
  }
  func.func @transform_2(%arg0: i32) -> (i32, i32, i32) {
    %c0_i32 = arith.constant 0 : i32
    %c0_i32_0 = arith.constant 0 : i32
    %c0_i32_1 = arith.constant 0 : i32
    %c0_i32_2 = arith.constant 0 : i32
    return %c0_i32, %c0_i32_0, %c0_i32_1 : i32, i32, i32
  }
  func.func @transform_3(%arg0: i32) -> (i32, i32) {
    %c0_i32 = arith.constant 0 : i32
    %c0_i32_0 = arith.constant 0 : i32
    return %arg0, %c0_i32 : i32, i32
  }
}

module attributes {stable_mosaic.version = 11 : i64} {
  func.func @_fused_mlp_kernel(%arg0: i32, %arg1: memref<8x32xf32, #tpu.memory_space<vmem>>, %arg2: memref<288x128xbf16, #tpu.memory_space<vmem>>, %arg3: memref<3x1x128xf32, #tpu.memory_space<vmem>>, %arg4: memref<8x128xf32, #tpu.memory_space<vmem>>) attributes {dimension_semantics = [#tpu.dimension_semantics<parallel>], iteration_bounds = array<i64: 1>, scalar_prefetch = 0 : i64, scratch_operands = 0 : i64, tpu.core_type = #tpu.core_type<tc>, window_params = [{transform_indices = @transform_0, window_bounds = array<i64: 8, 32>}, {pipeline_mode = #tpu.pipeline_mode<synchronous>, transform_indices = @transform_1, window_bounds = array<i64: 288, 128>}, {pipeline_mode = #tpu.pipeline_mode<synchronous>, transform_indices = @transform_2, window_bounds = array<i64: 3, 1, 128>}, {transform_indices = @transform_3, window_bounds = array<i64: 8, 128>}]} {
    %c0 = arith.constant 0 : index
    %c0_0 = arith.constant 0 : index
    %0 = vector.load %arg1[%c0, %c0_0] : memref<8x32xf32, #tpu.memory_space<vmem>>, vector<8x32xf32>
    %c0_1 = arith.constant 0 : index
    %c0_2 = arith.constant 0 : index
    %1 = vector.load %arg2[%c0_1, %c0_2] : memref<288x128xbf16, #tpu.memory_space<vmem>>, vector<32x128xbf16>
    %c0_3 = arith.constant 0 : index
    %c0_4 = arith.constant 0 : index
    %c0_5 = arith.constant 0 : index
    %2 = vector.load %arg3[%c0_3, %c0_4, %c0_5] : memref<3x1x128xf32, #tpu.memory_space<vmem>>, vector<1x1x128xf32>
    %3 = vector.shape_cast %2 : vector<1x1x128xf32> to vector<1x128xf32>
    %4 = arith.truncf %0 : vector<8x32xf32> to vector<8x32xbf16>
    %cst = arith.constant dense<0.000000e+00> : vector<8x128xf32>
    %5 = tpu.matmul %4, %1, %cst {dimension_numbers = #tpu.dot_dimension_numbers<[1], [0], [0], [1], [0, 0, 1, 1], [], []>} : vector<8x32xbf16>, vector<32x128xbf16>, vector<8x128xf32> -> vector<8x128xf32>
    %6 = vector.broadcast %3 : vector<1x128xf32> to vector<8x128xf32>
    %7 = arith.addf %5, %6 : vector<8x128xf32>
    %8 = math.tanh %7 : vector<8x128xf32>
    %c32 = arith.constant 32 : index
    %c0_6 = arith.constant 0 : index
    %9 = vector.load %arg2[%c32, %c0_6] : memref<288x128xbf16, #tpu.memory_space<vmem>>, vector<128x128xbf16>
    %c1 = arith.constant 1 : index
    %c0_7 = arith.constant 0 : index
    %c0_8 = arith.constant 0 : index
    %10 = vector.load %arg3[%c1, %c0_7, %c0_8] : memref<3x1x128xf32, #tpu.memory_space<vmem>>, vector<1x1x128xf32>
    %11 = vector.shape_cast %10 : vector<1x1x128xf32> to vector<1x128xf32>
    %12 = arith.truncf %8 : vector<8x128xf32> to vector<8x128xbf16>
    %cst_9 = arith.constant dense<0.000000e+00> : vector<8x128xf32>
    %13 = tpu.matmul %12, %9, %cst_9 {dimension_numbers = #tpu.dot_dimension_numbers<[1], [0], [0], [1], [0, 0, 1, 1], [], []>} : vector<8x128xbf16>, vector<128x128xbf16>, vector<8x128xf32> -> vector<8x128xf32>
    %14 = vector.broadcast %11 : vector<1x128xf32> to vector<8x128xf32>
    %15 = arith.addf %13, %14 : vector<8x128xf32>
    %16 = math.tanh %15 : vector<8x128xf32>
    %c160 = arith.constant 160 : index
    %c0_10 = arith.constant 0 : index
    %17 = vector.load %arg2[%c160, %c0_10] : memref<288x128xbf16, #tpu.memory_space<vmem>>, vector<128x128xbf16>
    %c2 = arith.constant 2 : index
    %c0_11 = arith.constant 0 : index
    %c0_12 = arith.constant 0 : index
    %18 = vector.load %arg3[%c2, %c0_11, %c0_12] : memref<3x1x128xf32, #tpu.memory_space<vmem>>, vector<1x1x128xf32>
    %19 = vector.shape_cast %18 : vector<1x1x128xf32> to vector<1x128xf32>
    %20 = arith.truncf %16 : vector<8x128xf32> to vector<8x128xbf16>
    %cst_13 = arith.constant dense<0.000000e+00> : vector<8x128xf32>
    %21 = tpu.matmul %20, %17, %cst_13 {dimension_numbers = #tpu.dot_dimension_numbers<[1], [0], [0], [1], [0, 0, 1, 1], [], []>} : vector<8x128xbf16>, vector<128x128xbf16>, vector<8x128xf32> -> vector<8x128xf32>
    %22 = vector.broadcast %19 : vector<1x128xf32> to vector<8x128xf32>
    %23 = arith.addf %21, %22 : vector<8x128xf32>
    %24 = math.tanh %23 : vector<8x128xf32>
    %c0_14 = arith.constant 0 : index
    %c0_15 = arith.constant 0 : index
    %25 = vector.load %arg4[%c0_14, %c0_15] : memref<8x128xf32, #tpu.memory_space<vmem>>, vector<8x128xf32>
    tpu.vector_store %arg4[%c0_14, %c0_15], %24 {strides = array<i32>} : memref<8x128xf32, #tpu.memory_space<vmem>>, vector<8x128xf32>,
    return
  }
  func.func @transform_0(%arg0: i32) -> (i32, i32) {
    %c0_i32 = arith.constant 0 : i32
    %c0_i32_0 = arith.constant 0 : i32
    return %arg0, %c0_i32 : i32, i32
  }
  func.func @transform_1(%arg0: i32) -> (i32, i32) {
    %c0_i32 = arith.constant 0 : i32
    %c0_i32_0 = arith.constant 0 : i32
    %c0_i32_1 = arith.constant 0 : i32
    return %c0_i32, %c0_i32_0 : i32, i32
  }
  func.func @transform_2(%arg0: i32) -> (i32, i32, i32) {
    %c0_i32 = arith.constant 0 : i32
    %c0_i32_0 = arith.constant 0 : i32
    %c0_i32_1 = arith.constant 0 : i32
    %c0_i32_2 = arith.constant 0 : i32
    return %c0_i32, %c0_i32_0, %c0_i32_1 : i32, i32, i32
  }
  func.func @transform_3(%arg0: i32) -> (i32, i32) {
    %c0_i32 = arith.constant 0 : i32
    %c0_i32_0 = arith.constant 0 : i32
    return %arg0, %c0_i32 : i32, i32
  }
}

</mosaic_0001>

<bundles_post_ra>
// kernel: tpu_custom_call.1
= control target key start
LH: loop header
LB: loop body
LE: loop exit
PB: predicated region body
PF: predicated region fallthrough
CT: control target
= control target key end

     0   :  { %8 = vsyncpa [#allocation3], 0  ;;  %s656_s0 = inlined_call_operand.hbm [shape: f32[8,32], index: 0, kind: input, shape index: {}]   ;;  %s657_s1 = inlined_call_operand.hbm [shape: bf16[288,128], index: 1, kind: input, shape index: {}]   ;;  %s658_s2 = inlined_call_operand.vmem [shape: f32[3,1,128], index: 2, kind: input, shape index: {}]   ;;  %s659_s3 = inlined_call_operand.hbm [shape: f32[8,128], index: 3, kind: output, shape index: {}]  }
   0x1   :  { %9 = vsyncpa [#allocation6], 0 }
   0x2   :  { %10 = vsyncpa [#allocation4], 0  ;;  %s553_s12 = smov [#allocation2]   ;;  %s554_s14 = smov [#allocation5]  }
   0x3   :  { %s17_s13 = sshll.u32 %s553_s12, 4  ;;  %s26_s15 = sshll.u32 %s554_s14, 4  ;;  %s18_s13 = int_to_ptr.vmem [resolvable:$true] %s17_s13  ;;  %s580_s15 = int_to_ptr.vmem [resolvable:$true] %s26_s15 }
   0x4   :  { %s481_s18 = scalar_lea.hbm %s656_s0, 128 }
   0x5   :  { %p482_p0 = scmp.ne.s32.totalorder %s656_s0, %s481_s18  ;;  %p485_p1 = scmp.lt.u32.totalorder %s481_s18, %s656_s0 }
   0x7   :  { %p487_p2 = pnand %p485_p1, %p482_p0 }
   0x9   :  { %490 = shalt.err (!%p487_p2)
}
   0xa   :  { %s491_s23 = scalar_lea.vmem %s18_s13, 128  ;;  %p496_p4 = scmp.lt.s32.totalorder %s18_s13, %s18_s13 }
   0xb   :  { %p492_p3 = scmp.ne.s32.totalorder %s18_s13, %s491_s23  ;;  %p497_p5 = scmp.lt.s32.totalorder %s491_s23, %s491_s23 }
   0xd   :  { %p498_p6 = por %p497_p5, %p496_p4 }
   0xf   :  { %p499_p7 = pnand %p498_p6, %p492_p3 }
  0x11   :  { %502 = shalt.err (!%p499_p7)
}
  0x12   :  { %20 = dma.hbm_to_vmem [thread:$0]  %s656_s0, 128, %s18_s13, [#allocation3]  }
  0x13   :  { %s503_s28 = scalar_lea.hbm %s657_s1, 2304 }
  0x14   :  { %p504_p8 = scmp.ne.s32.totalorder %s657_s1, %s503_s28  ;;  %p507_p9 = scmp.lt.u32.totalorder %s503_s28, %s657_s1 }
  0x16   :  { %p509_p10 = pnand %p507_p9, %p504_p8 }
  0x18   :  { %512 = shalt.err (!%p509_p10)
}
  0x19   :  { %s513_s6 = scalar_lea.vmem %s580_s15, 2304  ;;  %p518_p12 = scmp.lt.s32.totalorder %s580_s15, %s580_s15 }
  0x1a   :  { %p514_p11 = scmp.ne.s32.totalorder %s580_s15, %s513_s6  ;;  %p519_p13 = scmp.lt.s32.totalorder %s513_s6, %s513_s6 }
  0x1c   :  { %p520_p0 = por %p519_p13, %p518_p12 }
  0x1e   :  { %p521_p1 = pnand %p520_p0, %p514_p11 }
  0x20   :  { %524 = shalt.err (!%p521_p1)
}
  0x21   :  { %s555_s0 = smov 64   ;;  %s556_s7 = smov 4  }
  0x22   :  { %32 = dma.hbm_to_vmem [thread:$0]  %s657_s1, 2304, %s580_s15, [#allocation6], %s555_s0, %s555_s0, %s556_s7  }
  0x23   :  { %547 = dma.done.wait [#allocation3], 128  }
  0x24   :  { %548 = vsyncadd [#allocation3], 4294967168 }
  0x25   :  { %549 = dma.done.wait [#allocation6], 2304  }
  0x26   :  { %550 = vsyncadd [#allocation6], 4294964992  ;;  %v557_v0 = vmov 0.0   ;;  %vm558_vm0 = vmmov 0   ;;  %v457_v1 = vld [vmem:[#allocation5] sm:$0xff]   ;;  %v458_v2 = vld [vmem:[#allocation5 + $0x8] sm:$0xff]  }
  0x27   :  { %402 = vmatprep.subr.bf16.mxu0 %v557_v0  ;;  %406 = vmatprep.mubr.msk.bf16.mxu0 %vm558_vm0, %v557_v0  ;;  %v42_v3 = vld [vmem:[#allocation2] sm:$0xff]  ;;  %v459_v4 = vld [vmem:[#allocation5 + $0x10] sm:$0xff]   ;;  %vm67_vm1 = vcmask 261120   ;;  %v461_v7 = vld [vmem:[#allocation5 + $0x20] sm:$0xff]   ;;  %s559_s15 = smov [#allocation7]  }
  0x28   :  { %410 = vmatprep.subr.bf16.mxu1 %v557_v0  ;;  %426 = vmatprep.mubr.msk.bf16.mxu1 %vm558_vm0, %v557_v0  ;;  %v48_v5 = vpack.c.bf16 %v42_v3, %v42_v3  ;;  %v460_v6 = vld [vmem:[#allocation5 + $0x18] sm:$0xff]   ;;  %v462_v8 = vld [vmem:[#allocation5 + $0x28] sm:$0xff]   ;;  %v463_v9 = vld [vmem:[#allocation5 + $0x30] sm:$0xff]   ;;  %s347_s16 = sshll.u32 %s559_s15, 4  ;;  %s348_s16 = int_to_ptr.vmem [resolvable:$true] %s347_s16 }
  0x29   :  { %403 = vmatpush3.bf16.msra.mxu0 %v457_v1  ;;  %411 = vmatpush3.bf16.msra.mxu1 %v459_v4  ;;  %v464_v10 = vld [vmem:[#allocation5 + $0x38] sm:$0xff]   ;;  %v465_v11 = vld [vmem:[#allocation5 + $0x40] sm:$0xff]   ;;  %v466_v12 = vld [vmem:[#allocation5 + $0x48] sm:$0xff]   ;;  %s525_s17 = scalar_lea.vmem %s348_s16, 128  ;;  %p530_p3 = scmp.lt.s32.totalorder %s348_s16, %s348_s16 }
  0x2a   :  { %404 = vmatprep.subr.bf16.mxu0 %v557_v0  ;;  %412 = vmatprep.subr.bf16.mxu1 %v557_v0  ;;  %v467_v13 = vld [vmem:[#allocation5 + $0x50] sm:$0xff]   ;;  %v468_v14 = vld [vmem:[#allocation5 + $0x58] sm:$0xff]   ;;  %v469_v15 = vld [vmem:[#allocation5 + $0x60] sm:$0xff]   ;;  %p526_p2 = scmp.ne.s32.totalorder %s348_s16, %s525_s17  ;;  %p531_p4 = scmp.lt.s32.totalorder %s525_s17, %s525_s17 }
  0x2b   :  { %v470_v16 = vld [vmem:[#allocation5 + $0x68] sm:$0xff]   ;;  %v357_v17 = vld [vmem:[%s658_s2] ss:$0 sm:$0xff]  ;;  %v471_v25 = vld [vmem:[#allocation5 + $0x70] sm:$0xff]  }
  0x2c   :  { %v472_v26 = vld [vmem:[#allocation5 + $0x78] sm:$0xff]   ;;  %v473_v27 = vld [vmem:[#allocation5 + $0x80] sm:$0xff]   ;;  %v474_v28 = vld [vmem:[#allocation5 + $0x88] sm:$0xff]   ;;  %p532_p5 = por %p531_p4, %p530_p3 }
  0x2d   :  { %405 = vmatpush3.bf16.msra.mxu0 %v458_v2  ;;  %413 = vmatpush3.bf16.msra.mxu1 %v460_v6  ;;  %v362_v29 = vld [vmem:[%s658_s2 + $0x1] ss:$0 sm:$0xff]  ;;  %v372_v37 = vld [vmem:[%s658_s2 + $0x2] ss:$0 sm:$0xff] }
  0x2e   :  { %430 = vmatprep.subr.bf16.mxu0 %v557_v0  ;;  %414 = vmatprep.subr.bf16.mxu1 %v557_v0  ;;  %p533_p6 = pnand %p532_p5, %p526_p2 }
  0x30   :  { %407 = vmatmul.mubr.msk.bf16.vlgmr.msra.gmra.mrb[0].mxu0 %vm67_vm1, %v48_v5 }
  0x31   :  { %446 = vmatprep.mubr.msk.bf16.mxu0 %vm558_vm0, %v557_v0  ;;  %415 = vmatpush3.bf16.msra.mxu1 %v461_v7 }
  0x32   :  { %416 = vmatprep.subr.bf16.mxu1 %v557_v0  ;;  %431 = vmatpush3.bf16.msra.mxu0 %v467_v13 }
  0x33   :  { %432 = vmatprep.subr.bf16.mxu0 %v557_v0 }
  0x35   :  { %417 = vmatpush3.bf16.msra.mxu1 %v462_v8 }
  0x36   :  { %418 = vmatprep.subr.bf16.mxu1 %v557_v0  ;;  %433 = vmatpush3.bf16.msra.mxu0 %v468_v14 }
  0x37   :  { %434 = vmatprep.subr.bf16.mxu0 %v557_v0 }
  0x39   :  { %419 = vmatpush3.bf16.msra.mxu1 %v463_v9 }
  0x3a   :  { %420 = vmatprep.subr.bf16.mxu1 %v557_v0  ;;  %435 = vmatpush3.bf16.msra.mxu0 %v469_v15 }
  0x3b   :  { %436 = vmatprep.subr.bf16.mxu0 %v557_v0 }
  0x3d   :  { %421 = vmatpush3.bf16.msra.mxu1 %v464_v10 }
  0x3e   :  { %422 = vmatprep.subr.bf16.mxu1 %v557_v0  ;;  %437 = vmatpush3.bf16.msra.mxu0 %v470_v16 }
  0x3f   :  { %438 = vmatprep.subr.bf16.mxu0 %v557_v0 }
  0x41   :  { %423 = vmatpush3.bf16.msra.mxu1 %v465_v11 }
  0x42   :  { %424 = vmatprep.subr.bf16.mxu1 %v557_v0  ;;  %439 = vmatpush3.bf16.msra.mxu0 %v471_v25 }
  0x43   :  { %440 = vmatprep.subr.bf16.mxu0 %v557_v0 }
  0x45   :  { %425 = vmatpush3.bf16.msra.mxu1 %v466_v12 }
  0x46   :  { %441 = vmatpush3.bf16.msra.mxu0 %v472_v26 }
  0x47   :  { %442 = vmatprep.subr.bf16.mxu0 %v557_v0 }
  0x4a   :  { %443 = vmatpush3.bf16.msra.mxu0 %v473_v27 }
  0x4b   :  { %444 = vmatprep.subr.bf16.mxu0 %v557_v0 }
  0x4e   :  { %445 = vmatpush3.bf16.msra.mxu0 %v474_v28 }
 0x103   :  { %v105_v18 = vpop.f32.mrb[0].mxu0 }
 0x104   :  { %v106_v19 = vadd.f32 %v357_v17, %v105_v18  ;;  %v408_v20 = vpop.f32.mrb[1].mxu0 }
 0x105   :  { %v108_v21 = vpop.f32.mrb[2].mxu0 }
 0x106   :  { %475 = vtanh.f32 %v106_v19  ;;  %v409_v22 = vpop.f32.mrb[3].mxu0 }
 0x110   :  { %v476_v23 = vpop.eup %475 }
 0x111   :  { %v130_v24 = vpack.c.bf16 %v476_v23, %v476_v23 }
 0x113   :  { %427 = vmatmul.mubr.bf16.vlgmr.msra.gmra.mrb[0].mxu1 %v130_v24 }
 0x1e6   :  { %v219_v30 = vpop.f32.mrb[0].mxu1 }
 0x1e7   :  { %v220_v31 = vadd.f32 %v362_v29, %v219_v30  ;;  %v428_v32 = vpop.f32.mrb[1].mxu1 }
 0x1e8   :  { %v222_v33 = vpop.f32.mrb[2].mxu1 }
 0x1e9   :  { %477 = vtanh.f32 %v220_v31  ;;  %v429_v34 = vpop.f32.mrb[3].mxu1 }
 0x1f3   :  { %v478_v35 = vpop.eup %477 }
 0x1f4   :  { %v244_v36 = vpack.c.bf16 %v478_v35, %v478_v35 }
 0x1f6   :  { %447 = vmatmul.mubr.bf16.vlgmr.msra.gmra.mrb[4].mxu0 %v244_v36 }
 0x2c9   :  { %v333_v38 = vpop.f32.mrb[4].mxu0 }
 0x2ca   :  { %v334_v39 = vadd.f32 %v372_v37, %v333_v38  ;;  %v448_v40 = vpop.f32.mrb[5].mxu0 }
 0x2cb   :  { %v336_v41 = vpop.f32.mrb[6].mxu0 }
 0x2cc   :  { %479 = vtanh.f32 %v334_v39  ;;  %v449_v42 = vpop.f32.mrb[7].mxu0 }
 0x2d6   :  { %v480_v43 = vpop.eup %479 }
 0x2d7   :  { %340 = vst [vmem:[#allocation7] sm:$0xff] %v480_v43 }
 0x2d8   :  { %536 = shalt.err (!%p533_p6)
}
 0x2d9   :  { %s537_s19 = scalar_lea.hbm %s659_s3, 128 }
 0x2da   :  { %p538_p7 = scmp.ne.s32.totalorder %s659_s3, %s537_s19  ;;  %p541_p8 = scmp.lt.u32.totalorder %s537_s19, %s659_s3 }
 0x2dc   :  { %p543_p9 = pnand %p541_p8, %p538_p7 }
 0x2de   :  { %546 = shalt.err (!%p543_p9)
}
 0x2df   :  { %350 = dma.vmem_to_hbm [thread:$0]  %s348_s16, 128, %s659_s3, [#allocation4]  }
 0x2e0   :  { %551 = dma.done.wait [#allocation4], 128  }
 0x2e1   :  { %552 = vsyncadd [#allocation4], 4294967168 }
 0x2e2   :  { %354 = vsyncpa [#allocation3], 1 }
 0x2e3   :  { %355 = vsyncpa [#allocation6], 1 }
 0x2e4   :  { %356 = vsyncpa [#allocation4], 1 }

// kernel: tpu_custom_call.1
= control target key start
LH: loop header
LB: loop body
LE: loop exit
PB: predicated region body
PF: predicated region fallthrough
CT: control target
= control target key end

     0   :  { %8 = vsyncpa [#allocation3], 0  ;;  %s656_s0 = inlined_call_operand.hbm [shape: f32[8,32], index: 0, kind: input, shape index: {}]   ;;  %s657_s1 = inlined_call_operand.hbm [shape: bf16[288,128], index: 1, kind: input, shape index: {}]   ;;  %s658_s2 = inlined_call_operand.vmem [shape: f32[3,1,128], index: 2, kind: input, shape index: {}]   ;;  %s659_s3 = inlined_call_operand.hbm [shape: f32[8,128], index: 3, kind: output, shape index: {}]  }
   0x1   :  { %9 = vsyncpa [#allocation6], 0 }
   0x2   :  { %10 = vsyncpa [#allocation4], 0  ;;  %s553_s12 = smov [#allocation2]   ;;  %s554_s14 = smov [#allocation5]  }
   0x3   :  { %s17_s13 = sshll.u32 %s553_s12, 4  ;;  %s26_s15 = sshll.u32 %s554_s14, 4  ;;  %s18_s13 = int_to_ptr.vmem [resolvable:$true] %s17_s13  ;;  %s580_s15 = int_to_ptr.vmem [resolvable:$true] %s26_s15 }
   0x4   :  { %s481_s18 = scalar_lea.hbm %s656_s0, 128 }
   0x5   :  { %p482_p0 = scmp.ne.s32.totalorder %s656_s0, %s481_s18  ;;  %p485_p1 = scmp.lt.u32.totalorder %s481_s18, %s656_s0 }
   0x7   :  { %p487_p2 = pnand %p485_p1, %p482_p0 }
   0x9   :  { %490 = shalt.err (!%p487_p2)
}
   0xa   :  { %s491_s23 = scalar_lea.vmem %s18_s13, 128  ;;  %p496_p4 = scmp.lt.s32.totalorder %s18_s13, %s18_s13 }
   0xb   :  { %p492_p3 = scmp.ne.s32.totalorder %s18_s13, %s491_s23  ;;  %p497_p5 = scmp.lt.s32.totalorder %s491_s23, %s491_s23 }
   0xd   :  { %p498_p6 = por %p497_p5, %p496_p4 }
   0xf   :  { %p499_p7 = pnand %p498_p6, %p492_p3 }
  0x11   :  { %502 = shalt.err (!%p499_p7)
}
  0x12   :  { %20 = dma.hbm_to_vmem [thread:$0]  %s656_s0, 128, %s18_s13, [#allocation3]  }
  0x13   :  { %s503_s28 = scalar_lea.hbm %s657_s1, 2304 }
  0x14   :  { %p504_p8 = scmp.ne.s32.totalorder %s657_s1, %s503_s28  ;;  %p507_p9 = scmp.lt.u32.totalorder %s503_s28, %s657_s1 }
  0x16   :  { %p509_p10 = pnand %p507_p9, %p504_p8 }
  0x18   :  { %512 = shalt.err (!%p509_p10)
}
  0x19   :  { %s513_s6 = scalar_lea.vmem %s580_s15, 2304  ;;  %p518_p12 = scmp.lt.s32.totalorder %s580_s15, %s580_s15 }
  0x1a   :  { %p514_p11 = scmp.ne.s32.totalorder %s580_s15, %s513_s6  ;;  %p519_p13 = scmp.lt.s32.totalorder %s513_s6, %s513_s6 }
  0x1c   :  { %p520_p0 = por %p519_p13, %p518_p12 }
  0x1e   :  { %p521_p1 = pnand %p520_p0, %p514_p11 }
  0x20   :  { %524 = shalt.err (!%p521_p1)
}
  0x21   :  { %s555_s0 = smov 64   ;;  %s556_s7 = smov 4  }
  0x22   :  { %32 = dma.hbm_to_vmem [thread:$0]  %s657_s1, 2304, %s580_s15, [#allocation6], %s555_s0, %s555_s0, %s556_s7  }
  0x23   :  { %547 = dma.done.wait [#allocation3], 128  }
  0x24   :  { %548 = vsyncadd [#allocation3], 4294967168 }
  0x25   :  { %549 = dma.done.wait [#allocation6], 2304  }
  0x26   :  { %550 = vsyncadd [#allocation6], 4294964992  ;;  %v557_v0 = vmov 0.0   ;;  %vm558_vm0 = vmmov 0   ;;  %v457_v1 = vld [vmem:[#allocation5] sm:$0xff]   ;;  %v458_v2 = vld [vmem:[#allocation5 + $0x8] sm:$0xff]  }
  0x27   :  { %402 = vmatprep.subr.bf16.mxu0 %v557_v0  ;;  %406 = vmatprep.mubr.msk.bf16.mxu0 %vm558_vm0, %v557_v0  ;;  %v42_v3 = vld [vmem:[#allocation2] sm:$0xff]  ;;  %v459_v4 = vld [vmem:[#allocation5 + $0x10] sm:$0xff]   ;;  %vm67_vm1 = vcmask 261120   ;;  %v461_v7 = vld [vmem:[#allocation5 + $0x20] sm:$0xff]   ;;  %s559_s15 = smov [#allocation7]  }
  0x28   :  { %410 = vmatprep.subr.bf16.mxu1 %v557_v0  ;;  %426 = vmatprep.mubr.msk.bf16.mxu1 %vm558_vm0, %v557_v0  ;;  %v48_v5 = vpack.c.bf16 %v42_v3, %v42_v3  ;;  %v460_v6 = vld [vmem:[#allocation5 + $0x18] sm:$0xff]   ;;  %v462_v8 = vld [vmem:[#allocation5 + $0x28] sm:$0xff]   ;;  %v463_v9 = vld [vmem:[#allocation5 + $0x30] sm:$0xff]   ;;  %s347_s16 = sshll.u32 %s559_s15, 4  ;;  %s348_s16 = int_to_ptr.vmem [resolvable:$true] %s347_s16 }
  0x29   :  { %403 = vmatpush3.bf16.msra.mxu0 %v457_v1  ;;  %411 = vmatpush3.bf16.msra.mxu1 %v459_v4  ;;  %v464_v10 = vld [vmem:[#allocation5 + $0x38] sm:$0xff]   ;;  %v465_v11 = vld [vmem:[#allocation5 + $0x40] sm:$0xff]   ;;  %v466_v12 = vld [vmem:[#allocation5 + $0x48] sm:$0xff]   ;;  %s525_s17 = scalar_lea.vmem %s348_s16, 128  ;;  %p530_p3 = scmp.lt.s32.totalorder %s348_s16, %s348_s16 }
  0x2a   :  { %404 = vmatprep.subr.bf16.mxu0 %v557_v0  ;;  %412 = vmatprep.subr.bf16.mxu1 %v557_v0  ;;  %v467_v13 = vld [vmem:[#allocation5 + $0x50] sm:$0xff]   ;;  %v468_v14 = vld [vmem:[#allocation5 + $0x58] sm:$0xff]   ;;  %v469_v15 = vld [vmem:[#allocation5 + $0x60] sm:$0xff]   ;;  %p526_p2 = scmp.ne.s32.totalorder %s348_s16, %s525_s17  ;;  %p531_p4 = scmp.lt.s32.totalorder %s525_s17, %s525_s17 }
  0x2b   :  { %v470_v16 = vld [vmem:[#allocation5 + $0x68] sm:$0xff]   ;;  %v357_v17 = vld [vmem:[%s658_s2] ss:$0 sm:$0xff]  ;;  %v471_v25 = vld [vmem:[#allocation5 + $0x70] sm:$0xff]  }
  0x2c   :  { %v472_v26 = vld [vmem:[#allocation5 + $0x78] sm:$0xff]   ;;  %v473_v27 = vld [vmem:[#allocation5 + $0x80] sm:$0xff]   ;;  %v474_v28 = vld [vmem:[#allocation5 + $0x88] sm:$0xff]   ;;  %p532_p5 = por %p531_p4, %p530_p3 }
  0x2d   :  { %405 = vmatpush3.bf16.msra.mxu0 %v458_v2  ;;  %413 = vmatpush3.bf16.msra.mxu1 %v460_v6  ;;  %v362_v29 = vld [vmem:[%s658_s2 + $0x1] ss:$0 sm:$0xff]  ;;  %v372_v37 = vld [vmem:[%s658_s2 + $0x2] ss:$0 sm:$0xff] }
  0x2e   :  { %430 = vmatprep.subr.bf16.mxu0 %v557_v0  ;;  %414 = vmatprep.subr.bf16.mxu1 %v557_v0  ;;  %p533_p6 = pnand %p532_p5, %p526_p2 }
  0x30   :  { %407 = vmatmul.mubr.msk.bf16.vlgmr.msra.gmra.mrb[0].mxu0 %vm67_vm1, %v48_v5 }
  0x31   :  { %446 = vmatprep.mubr.msk.bf16.mxu0 %vm558_vm0, %v557_v0  ;;  %415 = vmatpush3.bf16.msra.mxu1 %v461_v7 }
  0x32   :  { %416 = vmatprep.subr.bf16.mxu1 %v557_v0  ;;  %431 = vmatpush3.bf16.msra.mxu0 %v467_v13 }
  0x33   :  { %432 = vmatprep.subr.bf16.mxu0 %v557_v0 }
  0x35   :  { %417 = vmatpush3.bf16.msra.mxu1 %v462_v8 }
  0x36   :  { %418 = vmatprep.subr.bf16.mxu1 %v557_v0  ;;  %433 = vmatpush3.bf16.msra.mxu0 %v468_v14 }
  0x37   :  { %434 = vmatprep.subr.bf16.mxu0 %v557_v0 }
  0x39   :  { %419 = vmatpush3.bf16.msra.mxu1 %v463_v9 }
  0x3a   :  { %420 = vmatprep.subr.bf16.mxu1 %v557_v0  ;;  %435 = vmatpush3.bf16.msra.mxu0 %v469_v15 }
  0x3b   :  { %436 = vmatprep.subr.bf16.mxu0 %v557_v0 }
  0x3d   :  { %421 = vmatpush3.bf16.msra.mxu1 %v464_v10 }
  0x3e   :  { %422 = vmatprep.subr.bf16.mxu1 %v557_v0  ;;  %437 = vmatpush3.bf16.msra.mxu0 %v470_v16 }
  0x3f   :  { %438 = vmatprep.subr.bf16.mxu0 %v557_v0 }
  0x41   :  { %423 = vmatpush3.bf16.msra.mxu1 %v465_v11 }
  0x42   :  { %424 = vmatprep.subr.bf16.mxu1 %v557_v0  ;;  %439 = vmatpush3.bf16.msra.mxu0 %v471_v25 }
  0x43   :  { %440 = vmatprep.subr.bf16.mxu0 %v557_v0 }
  0x45   :  { %425 = vmatpush3.bf16.msra.mxu1 %v466_v12 }
  0x46   :  { %441 = vmatpush3.bf16.msra.mxu0 %v472_v26 }
  0x47   :  { %442 = vmatprep.subr.bf16.mxu0 %v557_v0 }
  0x4a   :  { %443 = vmatpush3.bf16.msra.mxu0 %v473_v27 }
  0x4b   :  { %444 = vmatprep.subr.bf16.mxu0 %v557_v0 }
  0x4e   :  { %445 = vmatpush3.bf16.msra.mxu0 %v474_v28 }
 0x103   :  { %v105_v18 = vpop.f32.mrb[0].mxu0 }
 0x104   :  { %v106_v19 = vadd.f32 %v357_v17, %v105_v18  ;;  %v408_v20 = vpop.f32.mrb[1].mxu0 }
 0x105   :  { %v108_v21 = vpop.f32.mrb[2].mxu0 }
 0x106   :  { %475 = vtanh.f32 %v106_v19  ;;  %v409_v22 = vpop.f32.mrb[3].mxu0 }
 0x110   :  { %v476_v23 = vpop.eup %475 }
 0x111   :  { %v130_v24 = vpack.c.bf16 %v476_v23, %v476_v23 }
 0x113   :  { %427 = vmatmul.mubr.bf16.vlgmr.msra.gmra.mrb[0].mxu1 %v130_v24 }
 0x1e6   :  { %v219_v30 = vpop.f32.mrb[0].mxu1 }
 0x1e7   :  { %v220_v31 = vadd.f32 %v362_v29, %v219_v30  ;;  %v428_v32 = vpop.f32.mrb[1].mxu1 }
 0x1e8   :  { %v222_v33 = vpop.f32.mrb[2].mxu1 }
 0x1e9   :  { %477 = vtanh.f32 %v220_v31  ;;  %v429_v34 = vpop.f32.mrb[3].mxu1 }
 0x1f3   :  { %v478_v35 = vpop.eup %477 }
 0x1f4   :  { %v244_v36 = vpack.c.bf16 %v478_v35, %v478_v35 }
 0x1f6   :  { %447 = vmatmul.mubr.bf16.vlgmr.msra.gmra.mrb[4].mxu0 %v244_v36 }
 0x2c9   :  { %v333_v38 = vpop.f32.mrb[4].mxu0 }
 0x2ca   :  { %v334_v39 = vadd.f32 %v372_v37, %v333_v38  ;;  %v448_v40 = vpop.f32.mrb[5].mxu0 }
 0x2cb   :  { %v336_v41 = vpop.f32.mrb[6].mxu0 }
 0x2cc   :  { %479 = vtanh.f32 %v334_v39  ;;  %v449_v42 = vpop.f32.mrb[7].mxu0 }
 0x2d6   :  { %v480_v43 = vpop.eup %479 }
 0x2d7   :  { %340 = vst [vmem:[#allocation7] sm:$0xff] %v480_v43 }
 0x2d8   :  { %536 = shalt.err (!%p533_p6)
}
 0x2d9   :  { %s537_s19 = scalar_lea.hbm %s659_s3, 128 }
 0x2da   :  { %p538_p7 = scmp.ne.s32.totalorder %s659_s3, %s537_s19  ;;  %p541_p8 = scmp.lt.u32.totalorder %s537_s19, %s659_s3 }
 0x2dc   :  { %p543_p9 = pnand %p541_p8, %p538_p7 }
 0x2de   :  { %546 = shalt.err (!%p543_p9)
}
 0x2df   :  { %350 = dma.vmem_to_hbm [thread:$0]  %s348_s16, 128, %s659_s3, [#allocation4]  }
 0x2e0   :  { %551 = dma.done.wait [#allocation4], 128  }
 0x2e1   :  { %552 = vsyncadd [#allocation4], 4294967168 }
 0x2e2   :  { %354 = vsyncpa [#allocation3], 1 }
 0x2e3   :  { %355 = vsyncpa [#allocation6], 1 }
 0x2e4   :  { %356 = vsyncpa [#allocation4], 1 }

</bundles_post_ra>
